<compile_context>
chip_gen: v5e
topology: v5e:2x2
jax: 0.10.0
libtpu: 0.0.40
codegen_flags: <defaults>
</compile_context>

<pallas_src>
import jax
import jax.numpy as jnp
import numpy as np
from jax.experimental import pallas as pl
from jax.experimental.pallas import tpu as pltpu

EPS = 1e-5


def _pick_tm(hw, cap=2048):
    """Largest multiple of 128 that divides hw (and is <= cap); fallback hw."""
    best = None
    t = 128
    while t <= min(hw, cap):
        if hw % t == 0:
            best = t
        t += 128
    return best if best is not None else hw


def _im2col_T_nchw(x, kh, kw, stride, padding, dilation):
    """Patches, transposed: returns ([Cin*KH*KW, N*Hout*Wout], Hout, Wout).

    Row ordering (ci*KH*KW + di*KW + dj) matches PyTorch
    weight.reshape(Cout, Cin*KH*KW).  Column ordering is n*HW + h*Wout + w,
    i.e. the output comes back directly in NCHW layout.
    """
    n, c, h, w = x.shape
    xp = jnp.pad(x, ((0, 0), (0, 0), (padding, padding), (padding, padding)))
    hout = (h + 2 * padding - dilation * (kh - 1) - 1) // stride + 1
    wout = (w + 2 * padding - dilation * (kw - 1) - 1) // stride + 1
    cols = []
    for i in range(kh):
        for j in range(kw):
            hs, ws = i * dilation, j * dilation
            cols.append(xp[:, :, hs:hs + stride * hout:stride,
                               ws:ws + stride * wout:stride])   # (N,C,Hout,Wout)
    cols = jnp.stack(cols, axis=2)                               # (N,C,KH*KW,Ho,Wo)
    pT = cols.transpose(1, 2, 0, 3, 4).reshape(c * kh * kw, n * hout * wout)
    return pT, hout, wout


def _gemm_stats_kernel(w_ref, p_ref, f_ref, s_ref):
    # w: (Cout, K) bf16   p: (K, TM) bf16   f: (1, Cout, TM) f32
    # s: (1, 1, Cout, 2) f32  -> [:, 0] = sum, [:, 1] = sum of squares
    f = jnp.dot(w_ref[...], p_ref[...], preferred_element_type=jnp.float32)
    f_ref[0, :, :] = f
    s_ref[0, 0, :, 0:1] = jnp.sum(f, axis=1, keepdims=True)
    s_ref[0, 0, :, 1:2] = jnp.sum(f * f, axis=1, keepdims=True)


def _bn_relu_kernel(f_ref, scale_ref, shift_ref, o_ref):
    # f: (1, Cout, TM) f32   scale/shift: (Cout, 1) f32 broadcast over lanes
    f = f_ref[0, :, :]
    y = f * scale_ref[...] + shift_ref[...]
    o_ref[0, :, :] = jnp.maximum(y, 0.0)


def convolution_layer_forward(x, weight, bias, gamma, beta,
                              stride=1, padding=1, dilation=1):
    """x: (N, Cin, H, W) f32; weight: (Cout, Cin, KH, KW); bias/gamma/beta: (Cout,)."""
    del bias  # exactly cancelled by BN mean subtraction (see header comment)
    n, cin, h, w = x.shape
    cout, _, kh, kw = weight.shape
    k_dim = cin * kh * kw

    # bf16 GEMM operands (patches materialized in bf16 -> half the HBM bytes).
    pT, hout, wout = _im2col_T_nchw(x.astype(jnp.bfloat16),
                                    kh, kw, stride, padding, dilation)
    w2d = weight.reshape(cout, k_dim).astype(jnp.bfloat16)        # (Cout, K)

    hw = hout * wout
    tm = _pick_tm(hw)
    n_m = hw // tm

    params = pltpu.CompilerParams(
        dimension_semantics=("parallel", "parallel"),
        vmem_limit_bytes=32 * 1024 * 1024,   # fits v7x 64 MiB physical VMEM
    )

    # ---- pass 1: tiled GEMM + per-tile per-channel statistics ----
    f_conv, stats = pl.pallas_call(
        _gemm_stats_kernel,
        out_shape=(jax.ShapeDtypeStruct((n, cout, hw), jnp.float32),
                   jax.ShapeDtypeStruct((n, n_m, cout, 2), jnp.float32)),
        grid=(n, n_m),
        in_specs=[
            pl.BlockSpec((cout, k_dim), lambda b, m: (0, 0)),          # weight, resident
            pl.BlockSpec((k_dim, tm), lambda b, m: (0, b * n_m + m)),  # patch tile
        ],
        out_specs=(
            pl.BlockSpec((1, cout, tm), lambda b, m: (b, 0, m)),
            pl.BlockSpec((1, 1, cout, 2), lambda b, m: (b, m, 0, 0)),
        ),
        compiler_params=params,
    )(w2d, pT)

    # ---- tiny global reduction + scale/shift (per-channel scalars) ----
    cnt = jnp.float32(n * hw)
    ssum = stats[..., 0].sum(axis=(0, 1))                  # (Cout,)
    ssq = stats[..., 1].sum(axis=(0, 1))                   # (Cout,)
    mean = ssum / cnt
    var = jnp.maximum(ssq / cnt - mean * mean, 0.0)        # biased, like torch BN
    scale = gamma.astype(jnp.float32) * jax.lax.rsqrt(var + EPS)
    shift = beta.astype(jnp.float32) - mean * scale
    scale2 = scale.reshape(cout, 1)
    shift2 = shift.reshape(cout, 1)

    # ---- pass 2: apply affine BN + ReLU per tile ----
    out_flat = pl.pallas_call(
        _bn_relu_kernel,
        out_shape=jax.ShapeDtypeStruct((n, cout, hw), jnp.float32),
        grid=(n, n_m),
        in_specs=[
            pl.BlockSpec((1, cout, tm), lambda b, m: (b, 0, m)),
            pl.BlockSpec((cout, 1), lambda b, m: (0, 0)),
            pl.BlockSpec((cout, 1), lambda b, m: (0, 0)),
        ],
        out_specs=pl.BlockSpec((1, cout, tm), lambda b, m: (b, 0, m)),
        compiler_params=params,
    )(f_conv, scale2, shift2)

    # Already NCHW-ordered: only a free reshape, no transpose.
    return out_flat.reshape(n, cout, hout, wout)


def _reference(x, weight, bias, gamma, beta, stride=1, padding=1, dilation=1):
    # f32 reference on bf16-rounded conv operands (kernel uses bf16 MXU inputs).
    xr = x.astype(jnp.bfloat16).astype(jnp.float32)
    wr = weight.astype(jnp.bfloat16).astype(jnp.float32)
    f = jax.lax.conv_general_dilated(
        xr, wr, window_strides=(stride, stride),
        padding=((padding, padding), (padding, padding)),
        rhs_dilation=(dilation, dilation),
        dimension_numbers=("NCHW", "OIHW", "NCHW"))
    f = f + bias[None, :, None, None]           # bias kept here (BN cancels it)
    mean = f.mean(axis=(0, 2, 3), keepdims=True)
    var = f.var(axis=(0, 2, 3), keepdims=True)  # biased variance, matches torch BN
    fn = (f - mean) / jnp.sqrt(var + EPS)
    fn = fn * gamma[None, :, None, None] + beta[None, :, None, None]
    return jnp.maximum(fn, 0.0)


if __name__ == "__main__":
    key = jax.random.PRNGKey(0)
    k_x, k_w, k_b, k_g, k_beta = jax.random.split(key, 5)

    N, Cin, H, W = 2, 4, 16, 16
    Cout, KH, KW = 8, 3, 3

    x = jax.random.normal(k_x, (N, Cin, H, W), dtype=jnp.float32)
    fan_in = Cin * KH * KW
    weight = jax.random.normal(k_w, (Cout, Cin, KH, KW), dtype=jnp.float32) / np.sqrt(fan_in)
    bias = 0.1 * jax.random.normal(k_b, (Cout,), dtype=jnp.float32)
    gamma = 1.0 + 0.1 * jax.random.normal(k_g, (Cout,), dtype=jnp.float32)
    beta = 0.1 * jax.random.normal(k_beta, (Cout,), dtype=jnp.float32)

    out = convolution_layer_forward(x, weight, bias, gamma, beta)
    out = jax.block_until_ready(out)

    ref = _reference(x, weight, bias, gamma, beta)
    assert out.shape == (N, Cout, H, W)
    assert jnp.allclose(out, ref, atol=2e-3, rtol=2e-3), "mismatch vs reference"

    print("KERNEL_OK")
</pallas_src>

<mosaic_0001>
module attributes {stable_mosaic.version = 11 : i64} {
  func.func @_gemm_stats_kernel(%arg0: i32, %arg1: i32, %arg2: memref<8x36xbf16, #tpu.memory_space<vmem>>, %arg3: memref<36x256xbf16, #tpu.memory_space<vmem>>, %arg4: memref<1x8x256xf32, #tpu.memory_space<vmem>>, %arg5: memref<1x1x8x2xf32, #tpu.memory_space<vmem>>) attributes {dimension_semantics = [#tpu.dimension_semantics<parallel>, #tpu.dimension_semantics<parallel>], iteration_bounds = array<i64: 2, 1>, scalar_prefetch = 0 : i64, scratch_operands = 0 : i64, tpu.core_type = #tpu.core_type<tc>, window_params = [{pipeline_mode = #tpu.pipeline_mode<synchronous>, transform_indices = @transform_0, window_bounds = array<i64: 8, 36>}, {transform_indices = @transform_1, window_bounds = array<i64: 36, 256>}, {transform_indices = @transform_2, window_bounds = array<i64: 1, 8, 256>}, {transform_indices = @transform_3, window_bounds = array<i64: 1, 1, 8, 2>}]} {
    %c0 = arith.constant 0 : index
    %c0_0 = arith.constant 0 : index
    %0 = vector.load %arg2[%c0, %c0_0] : memref<8x36xbf16, #tpu.memory_space<vmem>>, vector<8x36xbf16>
    %c0_1 = arith.constant 0 : index
    %c0_2 = arith.constant 0 : index
    %1 = vector.load %arg3[%c0_1, %c0_2] : memref<36x256xbf16, #tpu.memory_space<vmem>>, vector<36x256xbf16>
    %cst = arith.constant dense<0.000000e+00> : vector<8x256xf32>
    %2 = tpu.matmul %0, %1, %cst {dimension_numbers = #tpu.dot_dimension_numbers<[1], [0], [0], [1], [0, 0, 1, 1], [], []>} : vector<8x36xbf16>, vector<36x256xbf16>, vector<8x256xf32> -> vector<8x256xf32>
    %c0_3 = arith.constant 0 : index
    %c0_4 = arith.constant 0 : index
    %c0_5 = arith.constant 0 : index
    %3 = vector.load %arg4[%c0_3, %c0_4, %c0_5] : memref<1x8x256xf32, #tpu.memory_space<vmem>>, vector<1x8x256xf32>
    %4 = vector.shape_cast %3 : vector<1x8x256xf32> to vector<8x256xf32>
    %5 = vector.shape_cast %2 : vector<8x256xf32> to vector<1x8x256xf32>
    tpu.vector_store %arg4[%c0_3, %c0_4, %c0_5], %5 {strides = array<i32>} : memref<1x8x256xf32, #tpu.memory_space<vmem>>, vector<1x8x256xf32>,
    %cst_6 = arith.constant dense<0.000000e+00> : vector<8xf32>
    %6 = vector.multi_reduction <add>, %2, %cst_6 [1] : vector<8x256xf32> to vector<8xf32>
    %7 = vector.shape_cast %6 : vector<8xf32> to vector<8x1xf32>
    %c0_7 = arith.constant 0 : index
    %c0_8 = arith.constant 0 : index
    %c0_9 = arith.constant 0 : index
    %c0_10 = arith.constant 0 : index
    %8 = vector.load %arg5[%c0_7, %c0_8, %c0_9, %c0_10] : memref<1x1x8x2xf32, #tpu.memory_space<vmem>>, vector<1x1x8x1xf32>
    %9 = vector.shape_cast %8 : vector<1x1x8x1xf32> to vector<8x1xf32>
    %10 = vector.shape_cast %7 : vector<8x1xf32> to vector<1x1x8x1xf32>
    tpu.vector_store %arg5[%c0_7, %c0_8, %c0_9, %c0_10], %10 {strides = array<i32>} : memref<1x1x8x2xf32, #tpu.memory_space<vmem>>, vector<1x1x8x1xf32>,
    %11 = arith.mulf %2, %2 : vector<8x256xf32>
    %cst_11 = arith.constant dense<0.000000e+00> : vector<8xf32>
    %12 = vector.multi_reduction <add>, %11, %cst_11 [1] : vector<8x256xf32> to vector<8xf32>
    %13 = vector.shape_cast %12 : vector<8xf32> to vector<8x1xf32>
    %c0_12 = arith.constant 0 : index
    %c0_13 = arith.constant 0 : index
    %c0_14 = arith.constant 0 : index
    %c1 = arith.constant 1 : index
    %14 = vector.load %arg5[%c0_12, %c0_13, %c0_14, %c1] : memref<1x1x8x2xf32, #tpu.memory_space<vmem>>, vector<1x1x8x1xf32>
    %15 = vector.shape_cast %14 : vector<1x1x8x1xf32> to vector<8x1xf32>
    %16 = vector.shape_cast %13 : vector<8x1xf32> to vector<1x1x8x1xf32>
    tpu.vector_store %arg5[%c0_12, %c0_13, %c0_14, %c1], %16 {strides = array<i32>} : memref<1x1x8x2xf32, #tpu.memory_space<vmem>>, vector<1x1x8x1xf32>,
    return
  }
  func.func @transform_0(%arg0: i32, %arg1: i32) -> (i32, i32) {
    %c0_i32 = arith.constant 0 : i32
    %c0_i32_0 = arith.constant 0 : i32
    %c0_i32_1 = arith.constant 0 : i32
    return %c0_i32, %c0_i32_0 : i32, i32
  }
  func.func @transform_1(%arg0: i32, %arg1: i32) -> (i32, i32) {
    %c1_i32 = arith.constant 1 : i32
    %0 = arith.muli %arg0, %c1_i32 : i32
    %1 = arith.addi %0, %arg1 : i32
    %c0_i32 = arith.constant 0 : i32
    %c0_i32_0 = arith.constant 0 : i32
    return %c0_i32, %1 : i32, i32
  }
  func.func @transform_2(%arg0: i32, %arg1: i32) -> (i32, i32, i32) {
    %c0_i32 = arith.constant 0 : i32
    %c0_i32_0 = arith.constant 0 : i32
    return %arg0, %c0_i32, %arg1 : i32, i32, i32
  }
  func.func @transform_3(%arg0: i32, %arg1: i32) -> (i32, i32, i32, i32) {
    %c0_i32 = arith.constant 0 : i32
    %c0_i32_0 = arith.constant 0 : i32
    %c0_i32_1 = arith.constant 0 : i32
    return %arg0, %arg1, %c0_i32, %c0_i32_0 : i32, i32, i32, i32
  }
}

</mosaic_0001>

<bundles_post_ra>
// kernel: tpu_custom_call.1
= control target key start
LH: loop header
LB: loop body
LE: loop exit
PB: predicated region body
PF: predicated region fallthrough
CT: control target
= control target key end

     0   :  { %s929_s0 = inlined_call_operand.hbm [shape: bf16[8,36], index: 0, kind: input, shape index: {}]   ;;  %s930_s1 = inlined_call_operand.hbm [shape: bf16[36,512], index: 1, kind: input, shape index: {}]   ;;  %s931_s2 = inlined_call_operand.hbm [shape: f32[2,8,256], index: 2, kind: output, shape index: {0}]   ;;  %s932_s3 = inlined_call_operand.vmem [shape: f32[2,1,8,2], index: 3, kind: output, shape index: {1}]  }
   0x1   :  { %935 = sst [smem:[#allocation12_spill]] %s929_s0 }
   0x2   :  { %9 = vsyncpa [#allocation3], 0 }
   0x3   :  { %10 = vsyncpa [#allocation6], 0 }
   0x4   :  { %12 = vsyncpa [#allocation6 + $0x1], 0 }
   0x5   :  { %13 = vsyncpa [#allocation4], 0 }
   0x6   :  { %15 = vsyncpa [#allocation4 + $0x1], 0  ;;  %s772_s12 = smov 0   ;;  %s774_s13 = smov 0  }
   0x7   :  { %s776_s14 = smov 0   ;;  %s778_s15 = smov 0  }
   0x8   :  { %s780_s16 = smov 0   ;;  %s782_s17 = smov 0  }
   0x9 LB: > { %936 = sst [smem:[#allocation11_spill]] %s746_s17  ;;  %s482_s18 = sadd.s32 4294967295, %s746_s17   ;;  %s746_s17 = sphi %s782_s17, %s21_s17   ;;  %s742_s16 = sphi %s780_s16, %s950_s16   ;;  %s738_s15 = sphi %s778_s15, %s949_s15   ;;  %s734_s14 = sphi %s776_s14, %s948_s14   ;;  %s730_s13 = sphi %s774_s13, %s947_s13   ;;  %s726_s12 = sphi %s772_s12, %s946_s12  }
   0xa   : > { %s483_s19 = sadd.s32 4294967294, %s746_s17   ;;  %s63_s20 = sadd.s32 1, %s734_s14 }
   0xb   : > { %p70_p0 = scmp.ne.s32.totalorder %s734_s14, %s730_s13  ;;  %p71_p1 = scmp.eq.s32.totalorder %s746_s17, 0 }
   0xc   : > { %p76_p2 = scmp.ne.s32.totalorder %s730_s13, %s726_s12  ;;  %p810_p3 = scmp.eq.s32.totalorder %s482_s18, 0 }
   0xd   : > { %p102_p4 = scmp.eq.s32.totalorder %s482_s18, 1  ;;  %p814_p5 = por %p71_p1, %p70_p0 }
   0xe   : > { %p108_p6 = scmp.eq.s32.totalorder %s483_s19, 1  ;;  %p820_p7 = por %p810_p3, %p76_p2 }
   0xf   : > { %p824_p8 = por %p102_p4, %p70_p0  ;;  %p484_p10 = scmp.ge.s32.totalorder %s746_s17, 1 }
  0x10   : > { %p828_p9 = por %p108_p6, %p76_p2  ;;  %p143_p11 = scmp.lt.s32.totalorder %s746_s17, 3 }
  0x11   : > { %s942_s0 = sld [smem:[#allocation12_spill]]  ;;  %s748_s30 = smov [#allocation2]  }
  0x12   : > { %p837_p12 = pnand %p484_p10, %p143_p11  ;;  %s157_s4 = sshll.u32 %s748_s30, 4  ;;  %s158_s4 = int_to_ptr.vmem [resolvable:$true] %s157_s4 }
  0x13   : > { %p486_p13 = scmp.ge.s32.totalorder %s746_s17, 2  ;;  %p545_p1 = scmp.lt.s32.totalorder %s746_s17, 2 }
  0x14   : > { %p532_p0 = pneg %p837_p12  ;;  %s33_s6 = sadd.s32 1, %s742_s16 }
  0x15   : > { %p849_p4 = pnand %p545_p1, %p814_p5  ;;  %p35_p6 = scmp.ge.s32.totalorder %s33_s6, 2 }
  0x16   : > { %p533_p2 = pnand %p532_p0, %p810_p3  ;;  %s168_s7 = sand.u32 1, %s734_s14  }
  0x17   : > { %s155_s28 = sshll.u32 %s942_s0, 4  ;;  %s952_s6 = smov (%p35_p6, %s33_s6), 0  ;;  %s156_s28 = int_to_ptr.hbm [resolvable:$true] %s155_s28 }
  0x18   : > { %535 = dma.hbm_to_vmem [thread:$0]  (!%p533_p2), %s156_s28, 64, %s158_s4, [#allocation3]  }
  0x19   : > { %s522_s8 = smul.u32 40, %s168_s7  ;;  %s60_s9 = ssub.s32 %s742_s16, %s952_s6 }
  0x1a   : > { %s516_s10 = sshll.u32 %s742_s16, 3  ;;  %p61_p10 = scmp.eq.s32.totalorder %s60_s9, 0 }
  0x1b   : > { %s178_s19 = scalar_lea.hbm %s930_s1, %s516_s10  ;;  %s172_s22 = scalar_lea.vmem [#allocation5], %s522_s8 }
  0x1c   : > { %s181_s26 = sshll.u32 %s172_s22, 4  ;;  %s179_s30 = sshll.u32 %s178_s19, 4  ;;  %s182_s26 = int_to_ptr.vmem [resolvable:$true] %s181_s26  ;;  %s180_s30 = int_to_ptr.hbm [resolvable:$true] %s179_s30 }
  0x1d   : > { %s866_s27 = scalar_select %p61_p10, %s734_s14, %s63_s20  }
  0x1e   : > { %s169_s28 = scalar_lea.sflag [#allocation6], %s168_s7  ;;  %s749_s4 = smov 256  }
  0x1f   : > { %s750_s0 = smov 128   ;;  %s751_s17 = smov 8  }
  0x20   : > { %539 = dma.hbm_to_vmem [thread:$0]  (!%p849_p4), %s180_s30, 640, %s182_s26, %s169_s28, %s749_s4, %s750_s0, %s751_s17  }
  0x21   : > { %193 = sbr.rel (%p837_p12) target bundleno = 314 (0x13a), region = 28 }
  0x26   : > { %713 = dma.done.wait (%p810_p3), [#allocation3], 64  }
  0x27   : > { %715 = vsyncadd (%p810_p3), [#allocation3], 4294967232  ;;  %s877_s20 = sand.u32 1, %s730_s13  }
  0x28   : > { %s523_s7 = smul.u32 40, %s877_s20  ;;  %s201_s8 = scalar_lea.sflag [#allocation6], %s877_s20 }
  0x2a   : > { %s204_s9 = scalar_lea.vmem [#allocation5], %s523_s7 }
  0x2b   : > { %717 = dma.done.wait (%p820_p7), %s201_s8, 640  }
  0x2c   : > { %719 = vsyncadd (%p820_p7), %s201_s8, 4294966656  ;;  %v251_v0 = vld [vmem:[%s204_s9 + $0x20] sm:$0x33]  ;;  %vm281_vm0 = vcmask 1041408   ;;  %v503_v3 = vld [vmem:[%s204_s9 + $0x10] sm:$0xf] }
  0x2d   : > { %v265_v1 = vunpack.c.l.b16 %v251_v0  ;;  %v266_v2 = vunpack.c.h.b16 %v251_v0  ;;  %v520_v6 = vld [vmem:[%s204_s9 + $0x14] sm:$0xf0]  ;;  %v519_v7 = vld [vmem:[%s204_s9 + $0x14] sm:$0xf]  ;;  %v505_v8 = vld [vmem:[%s204_s9 + $0x18] sm:$0xf0] }
  0x2e   : > { %v504_v11 = vor.u32 %v520_v6, %v503_v3  ;;  %v508_v12 = vor.u32 %v519_v7, %v505_v8  ;;  %v495_v13 = vld [vmem:[%s204_s9] sm:$0xf]  ;;  %v518_v14 = vld [vmem:[%s204_s9 + $0x4] sm:$0xf0]  ;;  %v517_v15 = vld [vmem:[%s204_s9 + $0x4] sm:$0xf] }
  0x2f   : > { %v271_v4 = vpack.c.b16 %v265_v1, %v265_v1  ;;  %v272_v5 = vpack.c.b16 %v266_v2, %v266_v2  ;;  %v497_v16 = vld [vmem:[%s204_s9 + $0x8] sm:$0xf0]  ;;  %v496_v17 = vor.u32 %v518_v14, %v495_v13  ;;  %v246_v19 = vld [vmem:[#allocation2] sm:$0xf]  ;;  %vm277_vm1 = vcmask 293888   ;;  %s491_s0 = sshll.u32 %s877_s20, 4 }
  0x30   : > { %v500_v18 = vor.u32 %v517_v15, %v497_v16  ;;  %s225_s17 = scalar_lea.vmem [#allocation7], %s491_s0  ;;  %s521_s23 = sshll.u32 %s738_s15, 4 }
  0x31   : > { %v283_v9 = vsel %vm281_vm0, %v271_v4, 0  ;;  %v286_v10 = vsel %vm281_vm0, %v272_v5, 0  ;;  %s351_s21 = sshll.u32 %s225_s17, 4  ;;  %s349_s10 = scalar_lea.hbm %s931_s2, %s521_s23  ;;  %s352_s21 = int_to_ptr.vmem [resolvable:$true] %s351_s21 }
  0x32   : > { %293 = vmatpush.bf16.msra.mxu0 %v283_v9  ;;  %306 = vmatpush.bf16.msra.mxu1 %v286_v10  ;;  %s353_s11 = sshll.u32 %s349_s10, 4  ;;  %s329_s18 = scalar_lea.sflag [#allocation4], %s877_s20  ;;  %s354_s11 = int_to_ptr.hbm [resolvable:$true] %s353_s11 }
  0x33   : > { %s674_s19 = sshra.s32 %s354_s11, 4  ;;  %s680_s28 = scalar_lea.hbm %s931_s2, 32  ;;  %s675_s19 = int_to_ptr.hbm [resolvable:$true] %s674_s19 }
  0x34   : > { %s676_s22 = scalar_lea.hbm %s675_s19, 16  ;;  %p681_p11 = scmp.lt.s32.totalorder %s675_s19, %s931_s2 }
  0x35   : > { %p677_p3 = scmp.ne.s32.totalorder %s675_s19, %s676_s22  ;;  %p682_p12 = scmp.lt.s32.totalorder %s680_s28, %s676_s22 }
  0x36   : > { %294 = vmatpush.bf16.msra.mxu0 %v504_v11  ;;  %307 = vmatpush.bf16.msra.mxu1 %v508_v12 }
  0x37   : > { %p678_p5 = pnand %p677_p3, %p824_p8  ;;  %p683_p0 = por %p682_p12, %p681_p11 }
  0x39   : > { %p679_p7 = pneg %p678_p5 }
  0x3a   : > { %295 = vmatpush.bf16.msra.mxu0 %v496_v17  ;;  %308 = vmatpush.bf16.msra.mxu1 %v500_v18 }
  0x3b   : > { %p684_p1 = pnand %p683_p0, %p679_p7 }
  0x3d   : > { %509 = vmatmul.msk.bf16.vlgmr.msra.gmra.mxu0 %vm277_vm1, %v246_v19  ;;  %510 = vmatmul.msk.bf16.vlgmr.msra.gmra.mxu1 %vm277_vm1, %v246_v19 }
  0xba   : > { %v297_v20 = vpop.f32.mrf.mxu0  ;;  %v310_v21 = vpop.f32.mrf.mxu1 }
  0xbb   : > { %314 = vst [vmem:[%s225_s17] sm:$0xff] %v297_v20  ;;  %v316_v22 = vadd.f32 %v310_v21, %v297_v20 }
  0xbc   : > { %315 = vst [vmem:[%s225_s17 + $0x8] sm:$0xff] %v310_v21 }
  0xbd   : > { %317 = vadd.xlane.f32.xlu0 %v316_v22 }
  0xbe   : > { %687 = shalt.err (!%p684_p1)
}
  0xbf   : > { %530 = dma.vmem_to_hbm [thread:$0]  (%p824_p8), %s352_s21, 256, %s354_s11, %s329_s18   ;;  %v321_v23 = vmul.f32 %v297_v20, %v297_v20  ;;  %v322_v24 = vmul.f32 %v310_v21, %v310_v21  ;;  %vm319_vm2 = vcmask 7168   ;;  %vm326_vm3 = vcmask 15368  }
  0xc0   : > { %p238_p2 = scmp.lt.s32.totalorder %s738_s15, 1 }
  0xc1   : > { %v323_v27 = vadd.f32 %v322_v24, %v321_v23 }
  0xc2   : > { %v299_v25 = vpop.f32.mrf.mxu0  ;;  %v312_v26 = vpop.f32.mrf.mxu1  ;;  %s954_s15 = smov (!%p238_p2, %s738_s15), 1 }
  0xc3   : > { %s492_s20 = sshll.u32 %s954_s15, 3 }
  0xc4   : > { %s244_s0 = scalar_lea.vmem %s932_s3, %s492_s20 }
  0xc5   : > { %324 = vadd.xlane.f32.xlu0 %v323_v27 }
 0x130   : > { %v318_v28 = vpop.xlane.xlu0 %317 }
 0x131   : > { %320 = vst.msk [vmem:[%s244_s0] sm:$0xff] %vm319_vm2, %v318_v28 }
 0x138   : > { %v325_v29 = vpop.xlane.xlu0 %324 }
 0x139   : > { %327 = vst.msk [vmem:[%s244_s0] sm:$0xff] %vm326_vm3, %v325_v29 }
 0x13a PF: > { %s945_s24 = sld [smem:[#allocation11_spill]]  ;;  %s368_s17 = sand.u32 1, %s726_s12  }
 0x13b   : > { %p541_p8 = pnand %p486_p13, %p828_p9  ;;  %s369_s15 = scalar_lea.sflag [#allocation4], %s368_s17 }
 0x13d   : > { %p542_p4 = pneg %p541_p8 }
 0x13f   : > { %721 = dma.done.wait (%p542_p4), %s369_s15, 256  }
 0x140   : > { %723 = vsyncadd (%p542_p4), %s369_s15, 4294967040  ;;  %s21_s17 = sadd.s32 1, %s945_s24   ;;  %s946_s12 = smov %s730_s13 }
 0x141   : > { %p18_p6 = scmp.ge.s32.totalorder %s21_s17, 4   ;;  %s947_s13 = smov %s734_s14 }
 0x142   : > { %s948_s14 = smov %s866_s27  ;;  %s949_s15 = smov %s742_s16 }
 0x143   : > { %s950_s16 = smov %s952_s6  ;;  %20 = sbr.rel (!%p18_p6) target bundleno = 9 (0x9), region = 90 }
 0x148   :  { %385 = vsyncpa [#allocation3], 1 }
 0x149   :  { %387 = vsyncpa [#allocation3 + $0x1], 1 }
 0x14a   :  { %388 = vsyncpa [#allocation6], 1 }
 0x14b   :  { %390 = vsyncpa [#allocation6 + $0x1], 1 }
 0x14c   :  { %391 = vsyncpa [#allocation4], 1 }
 0x14d   :  { %393 = vsyncpa [#allocation4 + $0x1], 1 }

</bundles_post_ra>
